<compile_context>
chip_gen: v5e
topology: v5e:2x2
jax: 0.10.0
libtpu: 0.0.40
codegen_flags: <defaults>
</compile_context>

<pallas_src>
import functools

import jax
import jax.numpy as jnp
from jax import lax
from jax.experimental import pallas as pl
from jax.experimental.pallas import tpu as pltpu

IMG_SHAPE = 28 * 28  # 784
H1 = 256
H2 = 128
OUT = 1


def _leaky_relu(x, slope=0.2):
    # Equivalent to where(x > 0, x, slope*x) for slope in (0, 1).
    return jnp.maximum(x, slope * x)


def discriminator_kernel(x_ref, w1_ref, b1_ref, w2_ref, b2_ref, w3_ref, b3_ref,
                         o_ref):
    """Fused 3-layer MLP: (tb, 784) f32 batch tile -> (1, 1, tb) f32 logit row."""
    # In-kernel bf16 cast of the x tile (saves two host-side HBM passes).
    xb = x_ref[...].astype(jnp.bfloat16)

    # fc1: bf16 MXU matmul, f32 accumulate; bias + LeakyReLU in f32 on the VPU.
    h = jnp.dot(xb, w1_ref[...], preferred_element_type=jnp.float32)
    h = _leaky_relu(h + b1_ref[...])

    # fc2: cast activations to bf16 only for the MXU input, accumulate in f32.
    h = jnp.dot(h.astype(jnp.bfloat16), w2_ref[...],
                preferred_element_type=jnp.float32)
    h = _leaky_relu(h + b2_ref[...])

    # fc3 (out_features=1), lane-dense: w3 is an (8, H2) slab (row 0 = real
    # weights, rows 1-7 zero).  Contract both operands on their last dim
    # (A @ B^T pattern) so the result is already a lane-major (8, tb) block.
    logits = lax.dot_general(
        w3_ref[...], h.astype(jnp.bfloat16),
        dimension_numbers=(((1,), (1,)), ((), ())),
        preferred_element_type=jnp.float32)          # (8, tb); only row 0 used
    row = logits[0:1, :] + b3_ref[...]                # (1, tb)
    o_ref[...] = row.reshape(o_ref.shape).astype(o_ref.dtype)


def _round_up(n, m):
    return -(-n // m) * m


def _pick_tile(batch, tb_max):
    """Pick the batch-tile size (static Python int).

    - batch > tb_max: use tb_max (multiple of 8), ragged last tile allowed.
    - 512 < batch <= tb_max: split into >=2 tiles so both v7x cores get work.
    - batch <= 512: single tile equal to the full batch dim (always legal).
    """
    if batch > tb_max:
        return tb_max
    if batch > 512:
        return min(tb_max, _round_up(_round_up(batch, 2) // 2, 8))
    return batch


@functools.partial(jax.jit, static_argnames=("tb_max",))
def discriminator_forward(x, params, *, tb_max=1024):
    """x: (B, 784) float32.  Returns (B, 1) float32 logits."""
    w1, b1, w2, b2, w3, b3 = params
    B, F = x.shape
    assert F == IMG_SHAPE

    tb = _pick_tile(B, tb_max)
    num_tiles = pl.cdiv(B, tb)

    # Small, one-off weight preps (weights total < 0.5 MB).
    w1b = w1.astype(jnp.bfloat16)
    w2b = w2.astype(jnp.bfloat16)
    # fc3 weights as an (8, H2) bf16 slab: row 0 real, rows 1-7 zero, so the
    # final matmul has sublane-aligned M and a lane-dense result row.
    w3b = jnp.pad(w3.reshape(1, H2), ((0, 7), (0, 0))).astype(jnp.bfloat16)
    b1f = b1.reshape(1, H1).astype(jnp.float32)
    b2f = b2.reshape(1, H2).astype(jnp.float32)
    b3f = b3.reshape(1, 1).astype(jnp.float32)

    flops = 2 * B * (IMG_SHAPE * H1 + H1 * H2 + H2 * 8)
    bytes_accessed = (x.size * 4 + w1b.size * 2 + w2b.size * 2 + w3b.size * 2
                      + (b1f.size + b2f.size + b3f.size) * 4
                      + num_tiles * tb * 4)

    out = pl.pallas_call(
        discriminator_kernel,
        out_shape=jax.ShapeDtypeStruct((num_tiles, 1, tb), jnp.float32),
        grid_spec=pltpu.PrefetchScalarGridSpec(
            num_scalar_prefetch=0,
            grid=(num_tiles,),
            in_specs=[
                pl.BlockSpec((tb, IMG_SHAPE), lambda i: (i, 0)),   # x tile (f32)
                pl.BlockSpec((IMG_SHAPE, H1), lambda i: (0, 0)),   # w1 (bf16)
                pl.BlockSpec((1, H1), lambda i: (0, 0)),           # b1 (f32)
                pl.BlockSpec((H1, H2), lambda i: (0, 0)),          # w2 (bf16)
                pl.BlockSpec((1, H2), lambda i: (0, 0)),           # b2 (f32)
                pl.BlockSpec((8, H2), lambda i: (0, 0)),           # w3 slab (bf16)
                pl.BlockSpec((1, 1), lambda i: (0, 0)),            # b3 (f32)
            ],
            out_specs=pl.BlockSpec((1, 1, tb), lambda i: (i, 0, 0)),
        ),
        compiler_params=pltpu.CompilerParams(
            dimension_semantics=("parallel",),
            vmem_limit_bytes=48 * 1024 * 1024,
        ),
        cost_estimate=pl.CostEstimate(
            flops=flops, transcendentals=0, bytes_accessed=bytes_accessed),
    )(x, w1b, b1f, w2b, b2f, w3b, b3f)

    # (num_tiles, 1, tb) lane-major rows -> (B, 1) column of logits.
    return out.reshape(num_tiles * tb)[:B].reshape(B, OUT)


def init_params(key):
    """Deterministic init mirroring torch.nn.Linear default (U(-1/sqrt(in), +1/sqrt(in)))."""
    ks = jax.random.split(key, 6)

    def linear(kw, kb, fan_in, fan_out):
        bound = 1.0 / jnp.sqrt(jnp.float32(fan_in))
        w = jax.random.uniform(kw, (fan_in, fan_out), jnp.float32, -bound, bound)
        b = jax.random.uniform(kb, (1, fan_out), jnp.float32, -bound, bound)
        return w, b

    w1, b1 = linear(ks[0], ks[1], IMG_SHAPE, H1)
    w2, b2 = linear(ks[2], ks[3], H1, H2)
    w3, b3 = linear(ks[4], ks[5], H2, OUT)
    return (w1, b1, w2, b2, w3, b3)


def reference_forward(x, params):
    """Pure-JAX f32 reference for correctness checking."""
    w1, b1, w2, b2, w3, b3 = params
    h = jnp.maximum(x @ w1 + b1, 0.2 * (x @ w1 + b1))
    h = jnp.maximum(h @ w2 + b2, 0.2 * (h @ w2 + b2))
    return h @ w3 + b3


if __name__ == "__main__":
    key = jax.random.PRNGKey(0)
    k_params, k_x = jax.random.split(key)

    params = init_params(k_params)

    # Small batch of flattened 28x28 images: single tile (tile == batch).
    B_small = 8
    x_small = jax.random.normal(k_x, (B_small, IMG_SHAPE), jnp.float32)
    out_small = jax.block_until_ready(discriminator_forward(x_small, params))
    ref_small = reference_forward(x_small, params)
    assert out_small.shape == (B_small, OUT), out_small.shape
    assert jnp.allclose(out_small, ref_small, atol=5e-2, rtol=5e-2), \
        "mismatch vs reference (small batch)"

    # Multi-tile path: B=600 -> tb=304, grid=2, ragged last x tile (masked load).
    B_big = 600
    x_big = jax.random.normal(k_x, (B_big, IMG_SHAPE), jnp.float32)
    out_big = jax.block_until_ready(discriminator_forward(x_big, params))
    ref_big = reference_forward(x_big, params)
    assert out_big.shape == (B_big, OUT), out_big.shape
    assert jnp.allclose(out_big, ref_big, atol=5e-2, rtol=5e-2), \
        "mismatch vs reference (multi-tile batch)"

    print("KERNEL_OK")
</pallas_src>

<mosaic_0001>
module attributes {stable_mosaic.version = 11 : i64} {
  func.func @discriminator_kernel(%arg0: i32, %arg1: memref<8x784xf32, #tpu.memory_space<vmem>>, %arg2: memref<784x256xbf16, #tpu.memory_space<vmem>>, %arg3: memref<1x256xf32, #tpu.memory_space<vmem>>, %arg4: memref<256x128xbf16, #tpu.memory_space<vmem>>, %arg5: memref<1x128xf32, #tpu.memory_space<vmem>>, %arg6: memref<8x128xbf16, #tpu.memory_space<vmem>>, %arg7: memref<1x1xf32, #tpu.memory_space<vmem>>, %arg8: memref<1x1x8xf32, #tpu.memory_space<vmem>>) attributes {dimension_semantics = [#tpu.dimension_semantics<parallel>], iteration_bounds = array<i64: 1>, scalar_prefetch = 0 : i64, scratch_operands = 0 : i64, tpu.core_type = #tpu.core_type<tc>, window_params = [{transform_indices = @transform_0, window_bounds = array<i64: 8, 784>}, {pipeline_mode = #tpu.pipeline_mode<synchronous>, transform_indices = @transform_1, window_bounds = array<i64: 784, 256>}, {pipeline_mode = #tpu.pipeline_mode<synchronous>, transform_indices = @transform_2, window_bounds = array<i64: 1, 256>}, {pipeline_mode = #tpu.pipeline_mode<synchronous>, transform_indices = @transform_3, window_bounds = array<i64: 256, 128>}, {pipeline_mode = #tpu.pipeline_mode<synchronous>, transform_indices = @transform_4, window_bounds = array<i64: 1, 128>}, {pipeline_mode = #tpu.pipeline_mode<synchronous>, transform_indices = @transform_5, window_bounds = array<i64: 8, 128>}, {pipeline_mode = #tpu.pipeline_mode<synchronous>, transform_indices = @transform_6, window_bounds = array<i64: 1, 1>}, {transform_indices = @transform_7, window_bounds = array<i64: 1, 1, 8>}]} {
    %c0 = arith.constant 0 : index
    %c0_0 = arith.constant 0 : index
    %0 = vector.load %arg1[%c0, %c0_0] : memref<8x784xf32, #tpu.memory_space<vmem>>, vector<8x784xf32>
    %1 = arith.truncf %0 : vector<8x784xf32> to vector<8x784xbf16>
    %c0_1 = arith.constant 0 : index
    %c0_2 = arith.constant 0 : index
    %2 = vector.load %arg2[%c0_1, %c0_2] : memref<784x256xbf16, #tpu.memory_space<vmem>>, vector<784x256xbf16>
    %cst = arith.constant dense<0.000000e+00> : vector<8x256xf32>
    %3 = tpu.matmul %1, %2, %cst {dimension_numbers = #tpu.dot_dimension_numbers<[1], [0], [0], [1], [0, 0, 1, 1], [], []>} : vector<8x784xbf16>, vector<784x256xbf16>, vector<8x256xf32> -> vector<8x256xf32>
    %c0_3 = arith.constant 0 : index
    %c0_4 = arith.constant 0 : index
    %4 = vector.load %arg3[%c0_3, %c0_4] : memref<1x256xf32, #tpu.memory_space<vmem>>, vector<1x256xf32>
    %5 = vector.broadcast %4 : vector<1x256xf32> to vector<8x256xf32>
    %6 = arith.addf %3, %5 : vector<8x256xf32>
    %cst_5 = arith.constant 2.000000e-01 : f32
    %7 = vector.broadcast %cst_5 : f32 to vector<8x256xf32>
    %8 = arith.mulf %7, %6 : vector<8x256xf32>
    %9 = arith.maximumf %6, %8 : vector<8x256xf32>
    %10 = arith.truncf %9 : vector<8x256xf32> to vector<8x256xbf16>
    %c0_6 = arith.constant 0 : index
    %c0_7 = arith.constant 0 : index
    %11 = vector.load %arg4[%c0_6, %c0_7] : memref<256x128xbf16, #tpu.memory_space<vmem>>, vector<256x128xbf16>
    %cst_8 = arith.constant dense<0.000000e+00> : vector<8x128xf32>
    %12 = tpu.matmul %10, %11, %cst_8 {dimension_numbers = #tpu.dot_dimension_numbers<[1], [0], [0], [1], [0, 0, 1, 1], [], []>} : vector<8x256xbf16>, vector<256x128xbf16>, vector<8x128xf32> -> vector<8x128xf32>
    %c0_9 = arith.constant 0 : index
    %c0_10 = arith.constant 0 : index
    %13 = vector.load %arg5[%c0_9, %c0_10] : memref<1x128xf32, #tpu.memory_space<vmem>>, vector<1x128xf32>
    %14 = vector.broadcast %13 : vector<1x128xf32> to vector<8x128xf32>
    %15 = arith.addf %12, %14 : vector<8x128xf32>
    %cst_11 = arith.constant 2.000000e-01 : f32
    %16 = vector.broadcast %cst_11 : f32 to vector<8x128xf32>
    %17 = arith.mulf %16, %15 : vector<8x128xf32>
    %18 = arith.maximumf %15, %17 : vector<8x128xf32>
    %c0_12 = arith.constant 0 : index
    %c0_13 = arith.constant 0 : index
    %19 = vector.load %arg6[%c0_12, %c0_13] : memref<8x128xbf16, #tpu.memory_space<vmem>>, vector<8x128xbf16>
    %20 = arith.truncf %18 : vector<8x128xf32> to vector<8x128xbf16>
    %cst_14 = arith.constant dense<0.000000e+00> : vector<8x8xf32>
    %21 = tpu.matmul %19, %20, %cst_14 {dimension_numbers = #tpu.dot_dimension_numbers<[1], [1], [0], [0], [0, 0, 1, 0], [], []>} : vector<8x128xbf16>, vector<8x128xbf16>, vector<8x8xf32> -> vector<8x8xf32>
    %22 = vector.extract_strided_slice %21 {offsets = [0, 0], sizes = [1, 8], strides = [1, 1]} : vector<8x8xf32> to vector<1x8xf32>
    %c0_15 = arith.constant 0 : index
    %c0_16 = arith.constant 0 : index
    %23 = vector.load %arg7[%c0_15, %c0_16] : memref<1x1xf32, #tpu.memory_space<vmem>>, vector<1x1xf32>
    %24 = vector.broadcast %23 : vector<1x1xf32> to vector<1x8xf32>
    %25 = arith.addf %22, %24 : vector<1x8xf32>
    %26 = vector.shape_cast %25 : vector<1x8xf32> to vector<1x1x8xf32>
    %c0_17 = arith.constant 0 : index
    %c0_18 = arith.constant 0 : index
    %c0_19 = arith.constant 0 : index
    %27 = vector.load %arg8[%c0_17, %c0_18, %c0_19] : memref<1x1x8xf32, #tpu.memory_space<vmem>>, vector<1x1x8xf32>
    tpu.vector_store %arg8[%c0_17, %c0_18, %c0_19], %26 {strides = array<i32>} : memref<1x1x8xf32, #tpu.memory_space<vmem>>, vector<1x1x8xf32>,
    return
  }
  func.func @transform_0(%arg0: i32) -> (i32, i32) {
    %c0_i32 = arith.constant 0 : i32
    %c0_i32_0 = arith.constant 0 : i32
    return %arg0, %c0_i32 : i32, i32
  }
  func.func @transform_1(%arg0: i32) -> (i32, i32) {
    %c0_i32 = arith.constant 0 : i32
    %c0_i32_0 = arith.constant 0 : i32
    %c0_i32_1 = arith.constant 0 : i32
    return %c0_i32, %c0_i32_0 : i32, i32
  }
  func.func @transform_2(%arg0: i32) -> (i32, i32) {
    %c0_i32 = arith.constant 0 : i32
    %c0_i32_0 = arith.constant 0 : i32
    %c0_i32_1 = arith.constant 0 : i32
    return %c0_i32, %c0_i32_0 : i32, i32
  }
  func.func @transform_3(%arg0: i32) -> (i32, i32) {
    %c0_i32 = arith.constant 0 : i32
    %c0_i32_0 = arith.constant 0 : i32
    %c0_i32_1 = arith.constant 0 : i32
    return %c0_i32, %c0_i32_0 : i32, i32
  }
  func.func @transform_4(%arg0: i32) -> (i32, i32) {
    %c0_i32 = arith.constant 0 : i32
    %c0_i32_0 = arith.constant 0 : i32
    %c0_i32_1 = arith.constant 0 : i32
    return %c0_i32, %c0_i32_0 : i32, i32
  }
  func.func @transform_5(%arg0: i32) -> (i32, i32) {
    %c0_i32 = arith.constant 0 : i32
    %c0_i32_0 = arith.constant 0 : i32
    %c0_i32_1 = arith.constant 0 : i32
    return %c0_i32, %c0_i32_0 : i32, i32
  }
  func.func @transform_6(%arg0: i32) -> (i32, i32) {
    %c0_i32 = arith.constant 0 : i32
    %c0_i32_0 = arith.constant 0 : i32
    %c0_i32_1 = arith.constant 0 : i32
    return %c0_i32, %c0_i32_0 : i32, i32
  }
  func.func @transform_7(%arg0: i32) -> (i32, i32, i32) {
    %c0_i32 = arith.constant 0 : i32
    %c0_i32_0 = arith.constant 0 : i32
    %c0_i32_1 = arith.constant 0 : i32
    return %arg0, %c0_i32, %c0_i32_0 : i32, i32, i32
  }
}

</mosaic_0001>

<bundles_post_ra>
// kernel: discriminator_forward.1
= control target key start
LH: loop header
LB: loop body
LE: loop exit
PB: predicated region body
PF: predicated region fallthrough
CT: control target
= control target key end

     0   :  { %s2377_s0 = inlined_call_operand.vmem [shape: f32[8,784], index: 0, kind: input, shape index: {}]   ;;  %s2378_s1 = inlined_call_operand.vmem [shape: bf16[784,256], index: 1, kind: input, shape index: {}]   ;;  %s2379_s2 = inlined_call_operand.vmem [shape: f32[1,256], index: 2, kind: input, shape index: {}]   ;;  %s2380_s3 = inlined_call_operand.vmem [shape: bf16[256,128], index: 3, kind: input, shape index: {}]   ;;  %s2381_s4 = inlined_call_operand.vmem [shape: f32[1,128], index: 4, kind: input, shape index: {}]   ;;  %s2382_s5 = inlined_call_operand.vmem [shape: bf16[8,128], index: 5, kind: input, shape index: {}]   ;;  %s2383_s6 = inlined_call_operand.<no memory space> [shape: f32[1,1], index: 6, kind: input, shape index: {}]   ;;  %s2384_s7 = inlined_call_operand.hbm [shape: f32[1,1,8], index: 7, kind: output, shape index: {}]  }
   0x1   :  { %v12_v0 = vstv %s2383_s6 }
   0x2   :  { %13 = vst [vmem:[#allocation2] sm:$0x1] %v12_v0 }
   0x3   :  { %v1089_v1 = vld [vmem:[%s2378_s1 + $0x70] sm:$0xf]  ;;  %v1504_v2 = vld [vmem:[%s2378_s1 + $0x74] sm:$0xf0]  ;;  %v1081_v12 = vld [vmem:[%s2378_s1 + $0x60] sm:$0xf] }
   0x4   :  { %v1217_v3 = vld [vmem:[%s2378_s1 + $0x170] sm:$0xf]  ;;  %v1090_v4 = vor.u32 %v1504_v2, %v1089_v1  ;;  %v1536_v5 = vld [vmem:[%s2378_s1 + $0x174] sm:$0xf0]  ;;  %v1502_v14 = vld [vmem:[%s2378_s1 + $0x64] sm:$0xf0] }
   0x5   :  { %v1281_v6 = vld [vmem:[%s2378_s1 + $0x1f0] sm:$0xf]  ;;  %v1552_v7 = vld [vmem:[%s2378_s1 + $0x1f4] sm:$0xf0]  ;;  %v1218_v8 = vor.u32 %v1536_v5, %v1217_v3  ;;  %v1209_v15 = vld [vmem:[%s2378_s1 + $0x160] sm:$0xf]  ;;  %v1082_v17 = vor.u32 %v1502_v14, %v1081_v12 }
   0x6   :  { %v1282_v9 = vor.u32 %v1552_v7, %v1281_v6  ;;  %v1153_v10 = vld [vmem:[%s2378_s1 + $0xf0] sm:$0xf]  ;;  %v1520_v11 = vld [vmem:[%s2378_s1 + $0xf4] sm:$0xf0]  ;;  %642 = vmatpush.bf16.msra.mxu0 %v1090_v4  ;;  %v1534_v16 = vld [vmem:[%s2378_s1 + $0x164] sm:$0xf0] }
   0x7   :  { %v1154_v13 = vor.u32 %v1520_v11, %v1153_v10  ;;  %668 = vmatpush.bf16.msra.mxu2 %v1218_v8  ;;  %v1210_v18 = vor.u32 %v1534_v16, %v1209_v15  ;;  %v1273_v19 = vld [vmem:[%s2378_s1 + $0x1e0] sm:$0xf]  ;;  %v1550_v20 = vld [vmem:[%s2378_s1 + $0x1e4] sm:$0xf0]  ;;  %v1073_v24 = vld [vmem:[%s2378_s1 + $0x50] sm:$0xf] }
   0x8   :  { %681 = vmatpush.bf16.msra.mxu3 %v1282_v9  ;;  %v1145_v21 = vld [vmem:[%s2378_s1 + $0xe0] sm:$0xf]  ;;  %v1274_v22 = vor.u32 %v1550_v20, %v1273_v19  ;;  %v1518_v23 = vld [vmem:[%s2378_s1 + $0xe4] sm:$0xf0]  ;;  %v1500_v25 = vld [vmem:[%s2378_s1 + $0x54] sm:$0xf0] }
   0x9   :  { %655 = vmatpush.bf16.msra.mxu1 %v1154_v13  ;;  %v1146_v26 = vor.u32 %v1518_v23, %v1145_v21  ;;  %v1201_v27 = vld [vmem:[%s2378_s1 + $0x150] sm:$0xf]  ;;  %v1532_v28 = vld [vmem:[%s2378_s1 + $0x154] sm:$0xf0]  ;;  %v1074_v30 = vor.u32 %v1500_v25, %v1073_v24  ;;  %v1065_v36 = vld [vmem:[%s2378_s1 + $0x40] sm:$0xf] }
   0xa   :  { %v1265_v29 = vld [vmem:[%s2378_s1 + $0x1d0] sm:$0xf]  ;;  %643 = vmatpush.bf16.msra.mxu0 %v1082_v17  ;;  %v1548_v31 = vld [vmem:[%s2378_s1 + $0x1d4] sm:$0xf0]  ;;  %v1202_v34 = vor.u32 %v1532_v28, %v1201_v27  ;;  %v1498_v37 = vld [vmem:[%s2378_s1 + $0x44] sm:$0xf0] }
   0xb   :  { %v1137_v32 = vld [vmem:[%s2378_s1 + $0xd0] sm:$0xf]  ;;  %v1516_v33 = vld [vmem:[%s2378_s1 + $0xd4] sm:$0xf0]  ;;  %669 = vmatpush.bf16.msra.mxu2 %v1210_v18  ;;  %v1266_v35 = vor.u32 %v1548_v31, %v1265_v29  ;;  %v1193_v38 = vld [vmem:[%s2378_s1 + $0x140] sm:$0xf]  ;;  %v1066_v45 = vor.u32 %v1498_v37, %v1065_v36 }
   0xc   :  { %682 = vmatpush.bf16.msra.mxu3 %v1274_v22  ;;  %v1138_v39 = vor.u32 %v1516_v33, %v1137_v32  ;;  %v1530_v40 = vld [vmem:[%s2378_s1 + $0x144] sm:$0xf0]  ;;  %v1257_v41 = vld [vmem:[%s2378_s1 + $0x1c0] sm:$0xf]  ;;  %v1057_v48 = vld [vmem:[%s2378_s1 + $0x30] sm:$0xf] }
   0xd   :  { %656 = vmatpush.bf16.msra.mxu1 %v1146_v26  ;;  %v1546_v42 = vld [vmem:[%s2378_s1 + $0x1c4] sm:$0xf0]  ;;  %v1129_v43 = vld [vmem:[%s2378_s1 + $0xc0] sm:$0xf]  ;;  %v1194_v46 = vor.u32 %v1530_v40, %v1193_v38  ;;  %v1496_v49 = vld [vmem:[%s2378_s1 + $0x34] sm:$0xf0] }
   0xe   :  { %v1514_v44 = vld [vmem:[%s2378_s1 + $0xc4] sm:$0xf0]  ;;  %644 = vmatpush.bf16.msra.mxu0 %v1074_v30  ;;  %v1258_v47 = vor.u32 %v1546_v42, %v1257_v41  ;;  %v1185_v50 = vld [vmem:[%s2378_s1 + $0x130] sm:$0xf]  ;;  %v1528_v52 = vld [vmem:[%s2378_s1 + $0x134] sm:$0xf0]  ;;  %v1058_v57 = vor.u32 %v1496_v49, %v1057_v48 }
   0xf   :  { %670 = vmatpush.bf16.msra.mxu2 %v1202_v34  ;;  %v1130_v51 = vor.u32 %v1514_v44, %v1129_v43  ;;  %v1249_v53 = vld [vmem:[%s2378_s1 + $0x1b0] sm:$0xf]  ;;  %v1544_v54 = vld [vmem:[%s2378_s1 + $0x1b4] sm:$0xf0]  ;;  %v1186_v58 = vor.u32 %v1528_v52, %v1185_v50  ;;  %v1049_v60 = vld [vmem:[%s2378_s1 + $0x20] sm:$0xf] }
  0x10   :  { %683 = vmatpush.bf16.msra.mxu3 %v1266_v35  ;;  %v1121_v55 = vld [vmem:[%s2378_s1 + $0xb0] sm:$0xf]  ;;  %v1512_v56 = vld [vmem:[%s2378_s1 + $0xb4] sm:$0xf0]  ;;  %v1250_v59 = vor.u32 %v1544_v54, %v1249_v53  ;;  %v1494_v61 = vld [vmem:[%s2378_s1 + $0x24] sm:$0xf0] }
  0x11   :  { %657 = vmatpush.bf16.msra.mxu1 %v1138_v39  ;;  %v1177_v62 = vld [vmem:[%s2378_s1 + $0x120] sm:$0xf]  ;;  %v1122_v63 = vor.u32 %v1512_v56, %v1121_v55  ;;  %v1526_v0 = vld [vmem:[%s2378_s1 + $0x124] sm:$0xf0]  ;;  %v1050_v5 = vor.u32 %v1494_v61, %v1049_v60  ;;  %v1041_v8 = vld [vmem:[%s2378_s1 + $0x10] sm:$0xf] }
  0x12   :  { %645 = vmatpush.bf16.msra.mxu0 %v1066_v45  ;;  %v1241_v1 = vld [vmem:[%s2378_s1 + $0x1a0] sm:$0xf]  ;;  %v1542_v2 = vld [vmem:[%s2378_s1 + $0x1a4] sm:$0xf0]  ;;  %v1178_v6 = vor.u32 %v1526_v0, %v1177_v62  ;;  %v1492_v9 = vld [vmem:[%s2378_s1 + $0x14] sm:$0xf0] }
  0x13   :  { %671 = vmatpush.bf16.msra.mxu2 %v1194_v46  ;;  %v1113_v3 = vld [vmem:[%s2378_s1 + $0xa0] sm:$0xf]  ;;  %v1510_v4 = vld [vmem:[%s2378_s1 + $0xa4] sm:$0xf0]  ;;  %v1242_v7 = vor.u32 %v1542_v2, %v1241_v1  ;;  %v1169_v10 = vld [vmem:[%s2378_s1 + $0x110] sm:$0xf]  ;;  %v1042_v17 = vor.u32 %v1492_v9, %v1041_v8 }
  0x14   :  { %684 = vmatpush.bf16.msra.mxu3 %v1258_v47  ;;  %v1114_v11 = vor.u32 %v1510_v4, %v1113_v3  ;;  %v1524_v12 = vld [vmem:[%s2378_s1 + $0x114] sm:$0xf0]  ;;  %v1233_v13 = vld [vmem:[%s2378_s1 + $0x190] sm:$0xf]  ;;  %v1033_v18 = vld [vmem:[%s2378_s1] sm:$0xf] }
  0x15   :  { %658 = vmatpush.bf16.msra.mxu1 %v1130_v51  ;;  %v1540_v14 = vld [vmem:[%s2378_s1 + $0x194] sm:$0xf0]  ;;  %v1105_v15 = vld [vmem:[%s2378_s1 + $0x90] sm:$0xf]  ;;  %v1490_v19 = vld [vmem:[%s2378_s1 + $0x4] sm:$0xf0]  ;;  %v1170_v21 = vor.u32 %v1524_v12, %v1169_v10 }
  0x16   :  { %646 = vmatpush.bf16.msra.mxu0 %v1058_v57  ;;  %v1508_v16 = vld [vmem:[%s2378_s1 + $0x94] sm:$0xf0]  ;;  %v1161_v20 = vld [vmem:[%s2378_s1 + $0x100] sm:$0xf]  ;;  %v1234_v22 = vor.u32 %v1540_v14, %v1233_v13  ;;  %v1522_v23 = vld [vmem:[%s2378_s1 + $0x104] sm:$0xf0]  ;;  %v1034_v33 = vor.u32 %v1490_v19, %v1033_v18 }
  0x17   :  { %672 = vmatpush.bf16.msra.mxu2 %v1186_v58  ;;  %v1225_v24 = vld [vmem:[%s2378_s1 + $0x180] sm:$0xf]  ;;  %v1538_v25 = vld [vmem:[%s2378_s1 + $0x184] sm:$0xf0]  ;;  %v1106_v26 = vor.u32 %v1508_v16, %v1105_v15  ;;  %v1345_v27 = vld [vmem:[%s2378_s1 + $0x270] sm:$0xf]  ;;  %v1162_v37 = vor.u32 %v1522_v23, %v1161_v20 }
  0x18   :  { %685 = vmatpush.bf16.msra.mxu3 %v1250_v59  ;;  %v1568_v28 = vld [vmem:[%s2378_s1 + $0x274] sm:$0xf0]  ;;  %v1503_v29 = vld [vmem:[%s2378_s1 + $0x74] sm:$0xf]  ;;  %v1091_v30 = vld [vmem:[%s2378_s1 + $0x78] sm:$0xf0]  ;;  %v1226_v38 = vor.u32 %v1538_v25, %v1225_v24 }
  0x19   :  { %659 = vmatpush.bf16.msra.mxu1 %v1122_v63  ;;  %v1097_v31 = vld [vmem:[%s2378_s1 + $0x80] sm:$0xf]  ;;  %v1506_v32 = vld [vmem:[%s2378_s1 + $0x84] sm:$0xf0]  ;;  %v32_v34 = vld [vmem:[%s2377_s0 + $0x10] sm:$0xff]  ;;  %v1346_v42 = vor.u32 %v1568_v28, %v1345_v27  ;;  %v1094_v43 = vor.u32 %v1503_v29, %v1091_v30  ;;  %vm638_vm0 = vcmask 130048  }
  0x1a   :  { %647 = vmatpush.bf16.msra.mxu0 %v1050_v5  ;;  %v1417_v35 = vld [vmem:[%s2378_s1 + $0x300] sm:$0xf]  ;;  %v1586_v36 = vld [vmem:[%s2378_s1 + $0x304] sm:$0xf0]  ;;  %v1409_v39 = vld [vmem:[%s2378_s1 + $0x2f0] sm:$0xf]  ;;  %v1098_v47 = vor.u32 %v1506_v32, %v1097_v31  ;;  %v1918_v52 = vpack.c.bf16 %v32_v34, %v32_v34 }
  0x1b   :  { %673 = vmatpush.bf16.msra.mxu2 %v1178_v6  ;;  %v1584_v40 = vld [vmem:[%s2378_s1 + $0x2f4] sm:$0xf0]  ;;  %v1519_v41 = vld [vmem:[%s2378_s1 + $0xf4] sm:$0xf]  ;;  %v1155_v44 = vld [vmem:[%s2378_s1 + $0xf8] sm:$0xf0]  ;;  %v1418_v48 = vor.u32 %v1586_v36, %v1417_v35 }
  0x1c   :  { %686 = vmatpush.bf16.msra.mxu3 %v1242_v7  ;;  %v1337_v45 = vld [vmem:[%s2378_s1 + $0x260] sm:$0xf]  ;;  %v1566_v49 = vld [vmem:[%s2378_s1 + $0x264] sm:$0xf0]  ;;  %v1501_v50 = vld [vmem:[%s2378_s1 + $0x64] sm:$0xf]  ;;  %v1410_v53 = vor.u32 %v1584_v40, %v1409_v39  ;;  %v1158_v56 = vor.u32 %v1519_v41, %v1155_v44 }
  0x1d   :  { %660 = vmatpush.bf16.msra.mxu1 %v1114_v11  ;;  %v30_v46 = vld [vmem:[%s2377_s0] sm:$0xff]  ;;  %v1083_v51 = vld [vmem:[%s2378_s1 + $0x68] sm:$0xf0]  ;;  %v33_v54 = vld [vmem:[%s2377_s0 + $0x18] sm:$0xff]  ;;  %v1338_v60 = vor.u32 %v1566_v49, %v1337_v45 }
  0x1e   :  { %648 = vmatpush.bf16.msra.mxu0 %v1042_v17  ;;  %v31_v55 = vld [vmem:[%s2377_s0 + $0x8] sm:$0xff]  ;;  %v1401_v57 = vld [vmem:[%s2378_s1 + $0x2e0] sm:$0xf]  ;;  %v1932_v59 = vpack.c.bf16 %v30_v46, %v30_v46  ;;  %v1086_v61 = vor.u32 %v1501_v50, %v1083_v51  ;;  %v1517_v62 = vld [vmem:[%s2378_s1 + $0xe4] sm:$0xf]  ;;  %v1952_v4 = vpack.c.bf16 %v33_v54, %v33_v54 }
  0x1f   :  { %674 = vmatpush.bf16.msra.mxu2 %v1170_v21  ;;  %v1582_v58 = vld [vmem:[%s2378_s1 + $0x2e4] sm:$0xf0]  ;;  %v1147_v63 = vld [vmem:[%s2378_s1 + $0xe8] sm:$0xf0]  ;;  %v1329_v0 = vld [vmem:[%s2378_s1 + $0x250] sm:$0xf]  ;;  %v1954_v5 = vpack.c.bf16 %v31_v55, %v31_v55 }
  0x20   :  { %687 = vmatpush.bf16.msra.mxu3 %v1234_v22  ;;  %v1564_v1 = vld [vmem:[%s2378_s1 + $0x254] sm:$0xf0]  ;;  %v1499_v2 = vld [vmem:[%s2378_s1 + $0x54] sm:$0xf]  ;;  %v1075_v3 = vld [vmem:[%s2378_s1 + $0x58] sm:$0xf0]  ;;  %v1402_v6 = vor.u32 %v1582_v58, %v1401_v57  ;;  %v1150_v7 = vor.u32 %v1517_v62, %v1147_v63 }
  0x21   :  { %661 = vmatpush.bf16.msra.mxu1 %v1106_v26  ;;  %v1393_v8 = vld [vmem:[%s2378_s1 + $0x2d0] sm:$0xf]  ;;  %v1580_v9 = vld [vmem:[%s2378_s1 + $0x2d4] sm:$0xf0]  ;;  %v1330_v10 = vor.u32 %v1564_v1, %v1329_v0  ;;  %v1078_v11 = vor.u32 %v1499_v2, %v1075_v3  ;;  %v1515_v12 = vld [vmem:[%s2378_s1 + $0xd4] sm:$0xf] }
  0x22   :  { %649 = vmatpush.bf16.msra.mxu0 %v1034_v33  ;;  %v1139_v13 = vld [vmem:[%s2378_s1 + $0xd8] sm:$0xf0]  ;;  %v1321_v14 = vld [vmem:[%s2378_s1 + $0x240] sm:$0xf]  ;;  %v1562_v15 = vld [vmem:[%s2378_s1 + $0x244] sm:$0xf0]  ;;  %v1394_v18 = vor.u32 %v1580_v9, %v1393_v8 }
  0x23   :  { %675 = vmatpush.bf16.msra.mxu2 %v1162_v37  ;;  %v1497_v16 = vld [vmem:[%s2378_s1 + $0x44] sm:$0xf]  ;;  %v1067_v17 = vld [vmem:[%s2378_s1 + $0x48] sm:$0xf0]  ;;  %v1142_v19 = vor.u32 %v1515_v12, %v1139_v13  ;;  %v1385_v20 = vld [vmem:[%s2378_s1 + $0x2c0] sm:$0xf]  ;;  %v1322_v22 = vor.u32 %v1562_v15, %v1321_v14 }
  0x24   :  { %688 = vmatpush.bf16.msra.mxu3 %v1226_v38  ;;  %v1578_v21 = vld [vmem:[%s2378_s1 + $0x2c4] sm:$0xf0]  ;;  %v1070_v23 = vor.u32 %v1497_v16, %v1067_v17  ;;  %v1513_v24 = vld [vmem:[%s2378_s1 + $0xc4] sm:$0xf]  ;;  %v1131_v25 = vld [vmem:[%s2378_s1 + $0xc8] sm:$0xf0] }
  0x25   :  { %662 = vmatpush.bf16.msra.mxu1 %v1098_v47  ;;  %650 = vmatmul.bf16.vlgmr.msra.gmra.mxu0 %v1932_v59  ;;  %v1313_v26 = vld [vmem:[%s2378_s1 + $0x230] sm:$0xf]  ;;  %v1560_v27 = vld [vmem:[%s2378_s1 + $0x234] sm:$0xf0]  ;;  %v1495_v28 = vld [vmem:[%s2378_s1 + $0x34] sm:$0xf]  ;;  %v1386_v30 = vor.u32 %v1578_v21, %v1385_v20  ;;  %v1134_v31 = vor.u32 %v1513_v24, %v1131_v25 }
  0x26   :  { %694 = vmatpush.bf16.msrb.mxu0 %v1346_v42  ;;  %676 = vmatmul.bf16.vlgmr.msra.gmra.mxu2 %v1918_v52  ;;  %v1059_v29 = vld [vmem:[%s2378_s1 + $0x38] sm:$0xf0]  ;;  %v1377_v32 = vld [vmem:[%s2378_s1 + $0x2b0] sm:$0xf]  ;;  %v1576_v33 = vld [vmem:[%s2378_s1 + $0x2b4] sm:$0xf0]  ;;  %v1314_v35 = vor.u32 %v1560_v27, %v1313_v26 }
  0x27   :  { %727 = vmatpush.bf16.msrb.mxu2 %v1418_v48  ;;  %689 = vmatmul.bf16.vlgmr.msra.gmra.mxu3 %v1952_v4  ;;  %v36_v34 = vld [vmem:[%s2377_s0 + $0x30] sm:$0xff]  ;;  %v1062_v36 = vor.u32 %v1495_v28, %v1059_v29  ;;  %v1123_v38 = vld [vmem:[%s2378_s1 + $0xb8] sm:$0xf0]  ;;  %v1305_v39 = vld [vmem:[%s2378_s1 + $0x220] sm:$0xf] }
  0x28   :  { %733 = vmatpush.bf16.msrb.mxu3 %v1094_v43  ;;  %663 = vmatmul.bf16.vlgmr.msra.gmra.mxu1 %v1954_v5  ;;  %v1511_v37 = vld [vmem:[%s2378_s1 + $0xb4] sm:$0xf]  ;;  %v1558_v40 = vld [vmem:[%s2378_s1 + $0x224] sm:$0xf0]  ;;  %v1493_v41 = vld [vmem:[%s2378_s1 + $0x24] sm:$0xf]  ;;  %v1378_v43 = vor.u32 %v1576_v33, %v1377_v32  ;;  %v2035_v44 = vpack.c.bf16 %v36_v34, %v36_v34 }
  0x29   :  { %707 = vmatpush.bf16.msrb.mxu1 %v1410_v53  ;;  %v1051_v42 = vld [vmem:[%s2378_s1 + $0x28] sm:$0xf0]  ;;  %v1126_v45 = vor.u32 %v1511_v37, %v1123_v38  ;;  %v1369_v46 = vld [vmem:[%s2378_s1 + $0x2a0] sm:$0xf]  ;;  %v1574_v47 = vld [vmem:[%s2378_s1 + $0x2a4] sm:$0xf0]  ;;  %v1306_v48 = vor.u32 %v1558_v40, %v1305_v39 }
  0x2a   :  { %695 = vmatpush.bf16.msrb.mxu0 %v1338_v60  ;;  %v1054_v49 = vor.u32 %v1493_v41, %v1051_v42  ;;  %v1509_v50 = vld [vmem:[%s2378_s1 + $0xa4] sm:$0xf]  ;;  %v1115_v51 = vld [vmem:[%s2378_s1 + $0xa8] sm:$0xf0]  ;;  %v1297_v53 = vld [vmem:[%s2378_s1 + $0x210] sm:$0xf]  ;;  %v1370_v57 = vor.u32 %v1574_v47, %v1369_v46 }
  0x2b   :  { %746 = vmatpush.bf16.msra.mxu2 %v1158_v56  ;;  %v1556_v54 = vld [vmem:[%s2378_s1 + $0x214] sm:$0xf0]  ;;  %v1491_v55 = vld [vmem:[%s2378_s1 + $0x14] sm:$0xf]  ;;  %v1043_v56 = vld [vmem:[%s2378_s1 + $0x18] sm:$0xf0]  ;;  %v1118_v58 = vor.u32 %v1509_v50, %v1115_v51 }
  0x2c   :  { %734 = vmatpush.bf16.msrb.mxu3 %v1086_v61  ;;  %v1361_v60 = vld [vmem:[%s2378_s1 + $0x290] sm:$0xf]  ;;  %v1572_v61 = vld [vmem:[%s2378_s1 + $0x294] sm:$0xf0]  ;;  %v1507_v62 = vld [vmem:[%s2378_s1 + $0x94] sm:$0xf]  ;;  %v1298_v63 = vor.u32 %v1556_v54, %v1297_v53  ;;  %v1046_v0 = vor.u32 %v1491_v55, %v1043_v56 }
  0x2d   :  { %708 = vmatpush.bf16.msrb.mxu1 %v1402_v6  ;;  %v1107_v1 = vld [vmem:[%s2378_s1 + $0x98] sm:$0xf0]  ;;  %v1289_v2 = vld [vmem:[%s2378_s1 + $0x200] sm:$0xf]  ;;  %v1554_v3 = vld [vmem:[%s2378_s1 + $0x204] sm:$0xf0]  ;;  %v1362_v9 = vor.u32 %v1572_v61, %v1361_v60 }
  0x2e   :  { %696 = vmatpush.bf16.msrb.mxu0 %v1330_v10  ;;  %v1489_v6 = vld [vmem:[%s2378_s1 + $0x4] sm:$0xf]  ;;  %v1535_v8 = vld [vmem:[%s2378_s1 + $0x174] sm:$0xf]  ;;  %v1219_v10 = vld [vmem:[%s2378_s1 + $0x178] sm:$0xf0]  ;;  %v1110_v13 = vor.u32 %v1507_v62, %v1107_v1  ;;  %v1290_v17 = vor.u32 %v1554_v3, %v1289_v2 }
  0x2f   :  { %747 = vmatpush.bf16.msra.mxu2 %v1150_v7  ;;  %v1035_v7 = vld [vmem:[%s2378_s1 + $0x8] sm:$0xf0]  ;;  %v1347_v12 = vld [vmem:[%s2378_s1 + $0x278] sm:$0xf0]  ;;  %v1353_v14 = vld [vmem:[%s2378_s1 + $0x280] sm:$0xf] }
  0x30   :  { %735 = vmatpush.bf16.msrb.mxu3 %v1078_v11  ;;  %v1567_v11 = vld [vmem:[%s2378_s1 + $0x274] sm:$0xf]  ;;  %v1570_v15 = vld [vmem:[%s2378_s1 + $0x284] sm:$0xf0]  ;;  %v34_v16 = vld [vmem:[%s2377_s0 + $0x20] sm:$0xff] }
  0x31   :  { %709 = vmatpush.bf16.msrb.mxu1 %v1394_v18  ;;  %v1038_v18 = vor.u32 %v1489_v6, %v1035_v7  ;;  %v1099_v20 = vld [vmem:[%s2378_s1 + $0x88] sm:$0xf0]  ;;  %v1551_v21 = vld [vmem:[%s2378_s1 + $0x1f4] sm:$0xf]  ;;  %v1283_v24 = vld [vmem:[%s2378_s1 + $0x1f8] sm:$0xf0]  ;;  %v1354_v27 = vor.u32 %v1570_v15, %v1353_v14 }
  0x32   :  { %697 = vmatpush.bf16.msrb.mxu0 %v1322_v22  ;;  %v1222_v22 = vor.u32 %v1535_v8, %v1219_v10  ;;  %v1583_v25 = vld [vmem:[%s2378_s1 + $0x2f4] sm:$0xf]  ;;  %v1411_v26 = vld [vmem:[%s2378_s1 + $0x2f8] sm:$0xf0]  ;;  %v35_v28 = vld [vmem:[%s2377_s0 + $0x28] sm:$0xff] }
  0x33   :  { %748 = vmatpush.bf16.msra.mxu2 %v1142_v19  ;;  %v1505_v19 = vld [vmem:[%s2378_s1 + $0x84] sm:$0xf]  ;;  %v1339_v34 = vld [vmem:[%s2378_s1 + $0x268] sm:$0xf0]  ;;  %v2146_v38 = vpack.c.bf16 %v35_v28, %v35_v28  ;;  %v1203_v46 = vld [vmem:[%s2378_s1 + $0x158] sm:$0xf0] }
  0x34   :  { %736 = vmatpush.bf16.msrb.mxu3 %v1070_v23  ;;  %v1350_v23 = vor.u32 %v1567_v11, %v1347_v12  ;;  %v1533_v29 = vld [vmem:[%s2378_s1 + $0x164] sm:$0xf]  ;;  %v1102_v32 = vor.u32 %v1505_v19, %v1099_v20  ;;  %v1275_v40 = vld [vmem:[%s2378_s1 + $0x1e8] sm:$0xf0]  ;;  %v1563_v47 = vld [vmem:[%s2378_s1 + $0x254] sm:$0xf] }
  0x35   :  { %710 = vmatpush.bf16.msrb.mxu1 %v1386_v30  ;;  %v1211_v30 = vld [vmem:[%s2378_s1 + $0x168] sm:$0xf0]  ;;  %v1565_v33 = vld [vmem:[%s2378_s1 + $0x264] sm:$0xf]  ;;  %v1547_v51 = vld [vmem:[%s2378_s1 + $0x1d4] sm:$0xf] }
  0x36   :  { %698 = vmatpush.bf16.msrb.mxu0 %v1314_v35  ;;  %1423 = vmatmul.msk.bf16.vlgmr.msrb.gmra.mxu2 %vm638_vm0, %v2035_v44  ;;  %v1286_v35 = vor.u32 %v1551_v21, %v1283_v24  ;;  %v1549_v37 = vld [vmem:[%s2378_s1 + $0x1e4] sm:$0xf]  ;;  %v1214_v39 = vor.u32 %v1533_v29, %v1211_v30  ;;  %v1403_v42 = vld [vmem:[%s2378_s1 + $0x2e8] sm:$0xf0]  ;;  %v1267_v54 = vld [vmem:[%s2378_s1 + $0x1d8] sm:$0xf0] }
  0x37   :  { %749 = vmatpush.bf16.msra.mxu2 %v1134_v31  ;;  %v2135_v31 = vpack.c.bf16 %v34_v16, %v34_v16  ;;  %v1581_v41 = vld [vmem:[%s2378_s1 + $0x2e4] sm:$0xf]  ;;  %v1579_v55 = vld [vmem:[%s2378_s1 + $0x2d4] sm:$0xf]  ;;  %v1395_v56 = vld [vmem:[%s2378_s1 + $0x2d8] sm:$0xf0] }
  0x38   :  { %737 = vmatpush.bf16.msrb.mxu3 %v1062_v36  ;;  %v1414_v36 = vor.u32 %v1583_v25, %v1411_v26  ;;  %v1406_v50 = vor.u32 %v1581_v41, %v1403_v42  ;;  %v1195_v60 = vld [vmem:[%s2378_s1 + $0x148] sm:$0xf0]  ;;  %v1561_v61 = vld [vmem:[%s2378_s1 + $0x244] sm:$0xf] }
  0x39   :  { %711 = vmatpush.bf16.msrb.mxu1 %v1378_v43  ;;  %v1342_v43 = vor.u32 %v1565_v33, %v1339_v34  ;;  %v1323_v62 = vld [vmem:[%s2378_s1 + $0x248] sm:$0xf0] }
  0x3a   :  { %699 = vmatpush.bf16.msrb.mxu0 %v1306_v48  ;;  %v1331_v48 = vld [vmem:[%s2378_s1 + $0x258] sm:$0xf0] }
  0x3b   :  { %750 = vmatpush.bf16.msra.mxu2 %v1126_v45  ;;  %v1531_v45 = vld [vmem:[%s2378_s1 + $0x154] sm:$0xf] }
  0x3c   :  { %738 = vmatpush.bf16.msrb.mxu3 %v1054_v49  ;;  %v1278_v49 = vor.u32 %v1549_v37, %v1275_v40  ;;  %v1206_v53 = vor.u32 %v1531_v45, %v1203_v46 }
  0x3d   :  { %712 = vmatpush.bf16.msrb.mxu1 %v1370_v57  ;;  %v1334_v57 = vor.u32 %v1563_v47, %v1331_v48 }
  0x3e   :  { %700 = vmatpush.bf16.msrb.mxu0 %v1298_v63 }
  0x3f   :  { %751 = vmatpush.bf16.msra.mxu2 %v1118_v58  ;;  %v1529_v58 = vld [vmem:[%s2378_s1 + $0x144] sm:$0xf] }
  0x40   :  { %739 = vmatpush.bf16.msrb.mxu3 %v1046_v0 }
  0x41   :  { %713 = vmatpush.bf16.msrb.mxu1 %v1362_v9 }
  0x42   :  { %701 = vmatpush.bf16.msrb.mxu0 %v1290_v17 }
  0x43   :  { %752 = vmatpush.bf16.msra.mxu2 %v1110_v13 }
  0x44   :  { %740 = vmatpush.bf16.msrb.mxu3 %v1038_v18 }
  0x45   :  { %714 = vmatpush.bf16.msrb.mxu1 %v1354_v27  ;;  %702 = vmatmul.bf16.vlgmr.msrb.gmra.mxu0 %v2135_v31 }
  0x46   :  { %759 = vmatpush.bf16.msra.mxu0 %v1222_v22 }
  0x47   :  { %753 = vmatpush.bf16.msra.mxu2 %v1102_v32  ;;  %741 = vmatmul.bf16.vlgmr.msrb.gmra.mxu3 %v1932_v59 }
  0x48   :  { %785 = vmatpush.bf16.msra.mxu3 %v1350_v23  ;;  %715 = vmatmul.bf16.vlgmr.msrb.gmra.mxu1 %v2146_v38 }
  0x49   :  { %772 = vmatpush.bf16.msra.mxu1 %v1286_v35 }
  0x4a   :  { %760 = vmatpush.bf16.msra.mxu0 %v1214_v39  ;;  %754 = vmatmul.bf16.vlgmr.msra.gmra.mxu2 %v1954_v5 }
  0x4b   :  { %798 = vmatpush.bf16.msrb.mxu2 %v1414_v36 }
  0x4c   :  { %786 = vmatpush.bf16.msra.mxu3 %v1342_v43 }
  0x4d   :  { %14 = vsyncpa [#allocation4], 0  ;;  %773 = vmatpush.bf16.msra.mxu1 %v1278_v49  ;;  %v1270_v63 = vor.u32 %v1547_v51, %v1267_v54  ;;  %v1398_v0 = vor.u32 %v1579_v55, %v1395_v56  ;;  %v1545_v1 = vld [vmem:[%s2378_s1 + $0x1c4] sm:$0xf]  ;;  %v1198_v5 = vor.u32 %v1529_v58, %v1195_v60  ;;  %v1259_v2 = vld [vmem:[%s2378_s1 + $0x1c8] sm:$0xf0]  ;;  %v1326_v6 = vor.u32 %v1561_v61, %v1323_v62 }
  0x4e   :  { %761 = vmatpush.bf16.msra.mxu0 %v1206_v53  ;;  %v1577_v3 = vld [vmem:[%s2378_s1 + $0x2c4] sm:$0xf]  ;;  %v1387_v59 = vld [vmem:[%s2378_s1 + $0x2c8] sm:$0xf0]  ;;  %v1527_v7 = vld [vmem:[%s2378_s1 + $0x134] sm:$0xf]  ;;  %v1262_v11 = vor.u32 %v1545_v1, %v1259_v2 }
  0x4f   :  { %799 = vmatpush.bf16.msrb.mxu2 %v1406_v50  ;;  %v1187_v8 = vld [vmem:[%s2378_s1 + $0x138] sm:$0xf0]  ;;  %v1559_v9 = vld [vmem:[%s2378_s1 + $0x234] sm:$0xf]  ;;  %v1390_v12 = vor.u32 %v1577_v3, %v1387_v59  ;;  %v1525_v19 = vld [vmem:[%s2378_s1 + $0x124] sm:$0xf] }
  0x50   :  { %787 = vmatpush.bf16.msra.mxu3 %v1334_v57  ;;  %v1315_v10 = vld [vmem:[%s2378_s1 + $0x238] sm:$0xf0]  ;;  %v1543_v13 = vld [vmem:[%s2378_s1 + $0x1b4] sm:$0xf]  ;;  %v1190_v14 = vor.u32 %v1527_v7, %v1187_v8  ;;  %v1179_v20 = vld [vmem:[%s2378_s1 + $0x128] sm:$0xf0] }
  0x51   :  { %774 = vmatpush.bf16.msra.mxu1 %v1270_v63  ;;  %v1251_v15 = vld [vmem:[%s2378_s1 + $0x1b8] sm:$0xf0]  ;;  %v1575_v16 = vld [vmem:[%s2378_s1 + $0x2b4] sm:$0xf]  ;;  %v1318_v18 = vor.u32 %v1559_v9, %v1315_v10  ;;  %v1557_v21 = vld [vmem:[%s2378_s1 + $0x224] sm:$0xf]  ;;  %v1182_v26 = vor.u32 %v1525_v19, %v1179_v20 }
  0x52   :  { %762 = vmatpush.bf16.msra.mxu0 %v1198_v5  ;;  %v1379_v17 = vld [vmem:[%s2378_s1 + $0x2b8] sm:$0xf0]  ;;  %v1307_v22 = vld [vmem:[%s2378_s1 + $0x228] sm:$0xf0]  ;;  %v1254_v23 = vor.u32 %v1543_v13, %v1251_v15  ;;  %v1541_v25 = vld [vmem:[%s2378_s1 + $0x1a4] sm:$0xf] }
  0x53   :  { %800 = vmatpush.bf16.msrb.mxu2 %v1398_v0  ;;  %v1382_v24 = vor.u32 %v1575_v16, %v1379_v17  ;;  %v1243_v27 = vld [vmem:[%s2378_s1 + $0x1a8] sm:$0xf0]  ;;  %v1573_v28 = vld [vmem:[%s2378_s1 + $0x2a4] sm:$0xf]  ;;  %v1310_v30 = vor.u32 %v1557_v21, %v1307_v22  ;;  %v1523_v32 = vld [vmem:[%s2378_s1 + $0x114] sm:$0xf] }
  0x54   :  { %788 = vmatpush.bf16.msra.mxu3 %v1326_v6  ;;  %v1371_v29 = vld [vmem:[%s2378_s1 + $0x2a8] sm:$0xf0]  ;;  %v1171_v33 = vld [vmem:[%s2378_s1 + $0x118] sm:$0xf0]  ;;  %v1555_v34 = vld [vmem:[%s2378_s1 + $0x214] sm:$0xf]  ;;  %v1246_v36 = vor.u32 %v1541_v25, %v1243_v27 }
  0x55   :  { %775 = vmatpush.bf16.msra.mxu1 %v1262_v11  ;;  %v1299_v35 = vld [vmem:[%s2378_s1 + $0x218] sm:$0xf0]  ;;  %v1374_v37 = vor.u32 %v1573_v28, %v1371_v29  ;;  %v1539_v39 = vld [vmem:[%s2378_s1 + $0x194] sm:$0xf]  ;;  %v1174_v40 = vor.u32 %v1523_v32, %v1171_v33  ;;  %v1521_v46 = vld [vmem:[%s2378_s1 + $0x104] sm:$0xf] }
  0x56   :  { %763 = vmatpush.bf16.msra.mxu0 %v1190_v14  ;;  %v1235_v41 = vld [vmem:[%s2378_s1 + $0x198] sm:$0xf0]  ;;  %v1571_v42 = vld [vmem:[%s2378_s1 + $0x294] sm:$0xf]  ;;  %v1302_v45 = vor.u32 %v1555_v34, %v1299_v35  ;;  %v1163_v47 = vld [vmem:[%s2378_s1 + $0x108] sm:$0xf0] }
  0x57   :  { %801 = vmatpush.bf16.msrb.mxu2 %v1390_v12  ;;  %v1363_v43 = vld [vmem:[%s2378_s1 + $0x298] sm:$0xf0]  ;;  %v1553_v48 = vld [vmem:[%s2378_s1 + $0x204] sm:$0xf]  ;;  %v1291_v49 = vld [vmem:[%s2378_s1 + $0x208] sm:$0xf0]  ;;  %v1238_v53 = vor.u32 %v1539_v39, %v1235_v41  ;;  %v1166_v55 = vor.u32 %v1521_v46, %v1163_v47 }
  0x58   :  { %789 = vmatpush.bf16.msra.mxu3 %v1318_v18  ;;  %v1585_v50 = vld [vmem:[%s2378_s1 + $0x304] sm:$0xf]  ;;  %v1419_v51 = vld [vmem:[%s2378_s1 + $0x308] sm:$0xf0]  ;;  %v1366_v54 = vor.u32 %v1571_v42, %v1363_v43  ;;  %v1294_v58 = vor.u32 %v1553_v48, %v1291_v49  ;;  %v1594_v1 = vld [vmem:[%s2380_s3 + $0x38] sm:$0xff]  ;;  %s1634_s28 = smov [#allocation3]  }
  0x59   :  { %776 = vmatpush.bf16.msra.mxu1 %v1254_v23  ;;  %v1537_v56 = vld [vmem:[%s2378_s1 + $0x184] sm:$0xf]  ;;  %v1227_v57 = vld [vmem:[%s2378_s1 + $0x188] sm:$0xf0]  ;;  %v1422_v62 = vor.u32 %v1585_v50, %v1419_v51  ;;  %v1593_v5 = vld [vmem:[%s2380_s3 + $0x30] sm:$0xff]  ;;  %s1020_s29 = sshll.u32 %s1634_s28, 4  ;;  %s1021_s29 = int_to_ptr.vmem [resolvable:$true] %s1020_s29 }
  0x5a   :  { %764 = vmatpush.bf16.msra.mxu0 %v1182_v26  ;;  %v1569_v60 = vld [vmem:[%s2378_s1 + $0x284] sm:$0xf]  ;;  %v1355_v61 = vld [vmem:[%s2378_s1 + $0x288] sm:$0xf0]  ;;  %v1230_v63 = vor.u32 %v1537_v56, %v1227_v57  ;;  %v142_v7 = vld [vmem:[%s2379_s2] sm:$0x3] }
  0x5b   :  { %802 = vmatpush.bf16.msrb.mxu2 %v1382_v24  ;;  %v1358_v0 = vor.u32 %v1569_v60, %v1355_v61  ;;  %v1588_v2 = vld [vmem:[%s2380_s3 + $0x8] sm:$0xff]  ;;  %v1587_v6 = vld [vmem:[%s2380_s3] sm:$0xff]  ;;  %v1602_v10 = vld [vmem:[%s2380_s3 + $0x78] sm:$0xff]  ;;  %v144_v12 = vperm.slane %v142_v7, 0  ;;  %vm1013_vm1 = vcmask 57344  }
  0x5c   :  { %790 = vmatpush.bf16.msra.mxu3 %v1310_v30  ;;  %v1601_v14 = vld [vmem:[%s2380_s3 + $0x70] sm:$0xff]  ;;  %v1600_v20 = vld [vmem:[%s2380_s3 + $0x68] sm:$0xff]  ;;  %v1599_v26 = vld [vmem:[%s2380_s3 + $0x60] sm:$0xff] }
  0x5d   :  { %777 = vmatpush.bf16.msra.mxu1 %v1246_v36  ;;  %v1598_v29 = vld [vmem:[%s2380_s3 + $0x58] sm:$0xff]  ;;  %v1595_v43 = vld [vmem:[%s2380_s3 + $0x40] sm:$0xff] }
  0x5e   :  { %765 = vmatpush.bf16.msra.mxu0 %v1174_v40  ;;  %v1596_v40 = vld [vmem:[%s2380_s3 + $0x48] sm:$0xff] }
  0x5f   :  { %803 = vmatpush.bf16.msrb.mxu2 %v1374_v37  ;;  %v1597_v37 = vld [vmem:[%s2380_s3 + $0x50] sm:$0xff] }
  0x60   :  { %791 = vmatpush.bf16.msra.mxu3 %v1302_v45  ;;  %v145_v45 = vperm.slane %v142_v7, 1 }
  0x61   :  { %778 = vmatpush.bf16.msra.mxu1 %v1238_v53 }
  0x62   :  { %766 = vmatpush.bf16.msra.mxu0 %v1166_v55 }
  0x63   :  { %804 = vmatpush.bf16.msrb.mxu2 %v1366_v54 }
  0x64   :  { %792 = vmatpush.bf16.msra.mxu3 %v1294_v58 }
  0x65   :  { %779 = vmatpush.bf16.msra.mxu1 %v1230_v63  ;;  %767 = vmatmul.bf16.vlgmr.msra.gmra.mxu0 %v1918_v52  ;;  %v1592_v52 = vld [vmem:[%s2380_s3 + $0x28] sm:$0xff] }
  0x66   :  { %818 = vmatpush.bf16.msrb.mxu0 %v1422_v62 }
  0x67   :  { %793 = vmatmul.bf16.vlgmr.msra.gmra.mxu3 %v2135_v31  ;;  %805 = vmatpush.bf16.msrb.mxu2 %v1358_v0  ;;  %v1589_v31 = vld [vmem:[%s2380_s3 + $0x10] sm:$0xff] }
  0x68   :  { %780 = vmatmul.bf16.vlgmr.msra.gmra.mxu1 %v1952_v4  ;;  %v1591_v4 = vld [vmem:[%s2380_s3 + $0x20] sm:$0xff]  ;;  %975 = vmatpush.bf16.msrb.mxu3 %v1602_v10 }
  0x69   :  { %962 = vmatpush.bf16.msrb.mxu1 %v1594_v1 }
  0x6a   :  { %806 = vmatmul.bf16.vlgmr.msrb.gmra.mxu2 %v2146_v38 }
  0x6c   :  { %976 = vmatpush.bf16.msrb.mxu3 %v1601_v14 }
  0x6d   :  { %963 = vmatpush.bf16.msrb.mxu1 %v1593_v5 }
  0x70   :  { %977 = vmatpush.bf16.msrb.mxu3 %v1600_v20 }
  0x71   :  { %964 = vmatpush.bf16.msrb.mxu1 %v1592_v52 }
  0x74   :  { %978 = vmatpush.bf16.msrb.mxu3 %v1599_v26 }
  0x75   :  { %1424 = vmatmul.msk.bf16.vlgmr.msrb.gmra.mxu0 %vm638_vm0, %v2035_v44  ;;  %965 = vmatpush.bf16.msrb.mxu1 %v1591_v4  ;;  %v1590_v44 = vld [vmem:[%s2380_s3 + $0x18] sm:$0xff] }
  0x78   :  { %979 = vmatpush.bf16.msrb.mxu3 %v1598_v29 }
  0x79   :  { %966 = vmatpush.bf16.msrb.mxu1 %v1590_v44 }
  0x7c   :  { %980 = vmatpush.bf16.msrb.mxu3 %v1597_v37 }
  0x7d   :  { %967 = vmatpush.bf16.msrb.mxu1 %v1589_v31  ;;  %v1005_v31 = vld [vmem:[#allocation2] sm:$0x1] }
  0x80   :  { %981 = vmatpush.bf16.msrb.mxu3 %v1596_v40 }
  0x81   :  { %968 = vmatpush.bf16.msrb.mxu1 %v1588_v2  ;;  %v1606_v2 = vld [vmem:[%s2381_s4] ss:$0 sm:$0xff]  ;;  %s1022_s4 = sshll.u32 %s2384_s7, 4  ;;  %s1023_s4 = int_to_ptr.hbm [resolvable:$true] %s1022_s4 }
  0x84   :  { %982 = vmatpush.bf16.msrb.mxu3 %v1595_v43 }
  0x85   :  { %969 = vmatpush.bf16.msrb.mxu1 %v1587_v6 }
  0xa2   :  { %v651_v38 = vpop.f32.mrf.mxu0 }
  0xa3   :  { %v652_v15 = vadd.f32 %v651_v38, %v144_v12  ;;  %v1633_v38 = vmov 0  }
  0xa4   :  { %1605 = vset.pattern.permute.xlu0 %v1633_v38 }
  0xa5   :  { %v664_v3 = vpop.f32.mrf.mxu1  ;;  %1008 = vperm.xlu0 %1605, %v1005_v31  }
  0xa6   :  { %v665_v17 = vadd.f32 %v664_v3, %v652_v15 }
  0xa9   :  { %v677_v59 = vpop.f32.mrf.mxu2 }
  0xaa   :  { %v690_v8 = vpop.f32.mrf.mxu3  ;;  %v653_v9 = vpop.f32.mrf.mxu0  ;;  %v678_v19 = vadd.f32 %v677_v59, %v665_v17 }
  0xac   :  { %v691_v21 = vadd.f32 %v690_v8, %v678_v19 }
  0xad   :  { %v666_v11 = vpop.f32.mrf.mxu1 }
  0xae   :  { %v990_v11 = vld [vmem:[%s2382_s5] sm:$0xf] }
  0xb1   :  { %v679_v13 = vpop.f32.mrf.mxu2 }
  0xb2   :  { %v692_v16 = vpop.f32.mrf.mxu3 }
  0xb9   :  { %v729_v18 = vpop.f32.mrf.mxu2 }
  0xc1   :  { %v731_v24 = vpop.f32.mrf.mxu2 }
  0xc2   :  { %v703_v22 = vpop.f32.mrf.mxu0 }
  0xc3   :  { %v704_v23 = vadd.f32 %v703_v22, %v691_v21 }
  0xc5   :  { %v716_v25 = vpop.f32.mrf.mxu1 }
  0xc6   :  { %v717_v27 = vadd.f32 %v716_v25, %v704_v23 }
  0xc8   :  { %v730_v28 = vadd.f32 %v729_v18, %v717_v27 }
  0xca   :  { %v824_v30 = vmul.f32 0.2, %v730_v28  ;;  %v705_v32 = vpop.f32.mrf.mxu0  ;;  %v742_v35 = vpop.f32.mrf.mxu3 }
  0xcb   :  { %v743_v46 = vadd.f32 %v742_v35, %v145_v45 }
  0xcc   :  { %v826_v33 = vmax.f32 %v730_v28, %v824_v30 }
  0xcd   :  { %v755_v34 = vpop.f32.mrf.mxu2  ;;  %v718_v36 = vpop.f32.mrf.mxu1 }
  0xce   :  { %v828_v39 = vpack.c.bf16 %v826_v33, %v826_v33  ;;  %v756_v48 = vadd.f32 %v755_v34, %v743_v46 }
  0xd0   :  { %970 = vmatmul.bf16.vlgmr.msrb.gmra.mxu1 %v828_v39 }
  0xd2   :  { %v744_v42 = vpop.f32.mrf.mxu3 }
  0xd5   :  { %v757_v41 = vpop.f32.mrf.mxu2 }
  0xe2   :  { %v768_v47 = vpop.f32.mrf.mxu0 }
  0xe3   :  { %v769_v50 = vadd.f32 %v768_v47, %v756_v48 }
  0xe5   :  { %v781_v49 = vpop.f32.mrf.mxu1 }
  0xe6   :  { %v782_v54 = vadd.f32 %v781_v49, %v769_v50 }
  0xea   :  { %v794_v51 = vpop.f32.mrf.mxu3  ;;  %v770_v53 = vpop.f32.mrf.mxu0 }
  0xeb   :  { %v795_v56 = vadd.f32 %v794_v51, %v782_v54 }
  0xed   :  { %v807_v55 = vpop.f32.mrf.mxu2  ;;  %v783_v57 = vpop.f32.mrf.mxu1 }
  0xee   :  { %v808_v58 = vadd.f32 %v807_v55, %v795_v56 }
  0xf2   :  { %v796_v60 = vpop.f32.mrf.mxu3  ;;  %v820_v61 = vpop.f32.mrf.mxu0 }
  0xf3   :  { %v821_v62 = vadd.f32 %v820_v61, %v808_v58 }
  0xf5   :  { %v809_v63 = vpop.f32.mrf.mxu2  ;;  %v825_v0 = vmul.f32 0.2, %v821_v62 }
  0xf7   :  { %v827_v1 = vmax.f32 %v821_v62, %v825_v0 }
  0xf9   :  { %v829_v5 = vpack.c.bf16 %v827_v1, %v827_v1 }
  0xfa   :  { %v822_v52 = vpop.f32.mrf.mxu0 }
  0xfb   :  { %983 = vmatmul.bf16.vlgmr.msrb.gmra.mxu3 %v829_v5 }
 0x117   :  { %v1009_v12 = vpop.permute.xlu0 %1008 }
 0x118   :  { %v1011_v13 = vperm.slane %v1009_v12, 0 }
 0x14d   :  { %v971_v4 = vpop.f32.mrf.mxu1 }
 0x14e   :  { %v972_v3 = vadd.f32 %v1606_v2, %v971_v4 }
 0x155   :  { %v973_v44 = vpop.f32.mrf.mxu1 }
 0x17e   :  { %v984_v59 = vpop.f32.mrf.mxu3 }
 0x17f   :  { %v985_v6 = vadd.f32 %v984_v59, %v972_v3 }
 0x181   :  { %v988_v7 = vmul.f32 0.2, %v985_v6 }
 0x183   :  { %v989_v8 = vmax.f32 %v985_v6, %v988_v7 }
 0x185   :  { %v991_v9 = vpack.c.bf16 %v989_v8, %v989_v8 }
 0x186   :  { %v986_v10 = vpop.f32.mrf.mxu3 }
 0x187   :  { %999 = vmatpush.bf16.xpose.msra.mxu0 %v991_v9 }
 0x18e   :  { %1000 = vmatmul.bf16.vlgmr.msra.gmra.mxu0 %v990_v11 }
 0x20b   :  { %v1001_v14 = vpop.f32.mrf.mxu0 }
 0x20c   :  { %v1012_v15 = vadd.f32 %v1011_v13, %v1001_v14 }
 0x20e   :  { %1014 = vst.msk [vmem:[#allocation3] sm:$0x1] %vm1013_vm1, %v1012_v15 }
 0x20f   :  { %1025 = dma.vmem_to_hbm [thread:$0]  %s1021_s29, 16, %s1023_s4, [#allocation4]  }
 0x213   :  { %v1003_v16 = vpop.f32.mrf.mxu0 }
 0x214   :  { %1631 = dma.done.wait [#allocation4], 16  }
 0x215   :  { %1632 = vsyncadd [#allocation4], 4294967280 }
 0x216   :  { %1030 = vsyncpa [#allocation4], 1 }

</bundles_post_ra>
